<compile_context>
chip_gen: v7x
topology: tpu7x:2x2x1
jax: 0.10.0
libtpu: 0.0.40
codegen_flags: <defaults>
</compile_context>

<pallas_src>
import functools

import jax
import jax.numpy as jnp
from jax.experimental import pallas as pl
from jax.experimental.pallas import tpu as pltpu


def _round_up(n, m):
    return ((n + m - 1) // m) * m


# --------------------------------------------------------------------------------------
# import-time capability probes (narrow; lowering errors are never masked at call time)
# --------------------------------------------------------------------------------------
def _probe_single_buffer_weights():
    """True iff this jax build accepts pipeline_mode=pl.Buffered(1) on a BlockSpec."""
    try:
        pl.BlockSpec((8, 128), lambda i: (0, 0), pipeline_mode=pl.Buffered(1))
        return True
    except Exception:  # construction-only probe (missing API); not a lowering catch-all
        return False


_SINGLE_BUFFER_WEIGHTS = _probe_single_buffer_weights()


def _tpu_vmem_capacity_bytes():
    """Per-core VMEM capacity (generation-aware); conservative 64 MiB (v7x) fallback."""
    try:
        return int(pltpu.get_tpu_info().vmem_capacity_bytes)
    except Exception:
        return 64 << 20


def _is_v5e():
    try:
        kind = jax.devices()[0].device_kind.lower()
    except Exception:
        return False
    return ("v5 lite" in kind) or ("v5e" in kind) or ("v5litepod" in kind)


# --------------------------------------------------------------------------------------
# kernel
# --------------------------------------------------------------------------------------
def _l0rd_kernel(alpha_ref,            # SMEM scalar-prefetch: (1,) f32
                 x_ref, h_ref,         # (TB, Hp)
                 wx1_ref, wx2_ref,     # (Hp, 2Hp)  [Wgx|Wrx], [Wpx|Wox]
                 wh1_ref, wh2_ref,     # (Hp, 2Hp)  [Wgh|Wrh], [Wph|Woh]
                 b1_ref, b2_ref,       # (1, 2Hp)   [bg|br],   [bp|bo]   (f32)
                 out_ref, hnew_ref):   # (TB, Hp),  (TB, Hp)
    Hp = x_ref.shape[-1]
    mm_dtype = wx1_ref.dtype           # feed the MXU in the weights' dtype (bf16-friendly)

    x = x_ref[...]
    xm = x.astype(mm_dtype)
    h_last = h_ref[...].astype(jnp.float32)

    # ---- gate / candidate path: two (TB, 2Hp) MXU pushes feed the EUP tanh chain ----
    xw1 = jnp.dot(xm, wx1_ref[...], preferred_element_type=jnp.float32) + b1_ref[...]
    hw1 = jnp.dot(h_last.astype(mm_dtype), wh1_ref[...], preferred_element_type=jnp.float32)

    g = jnp.maximum(jnp.tanh(xw1[:, :Hp] + hw1[:, :Hp]), 0.0)   # ReTanh input gate
    r = jnp.tanh(xw1[:, Hp:] + hw1[:, Hp:])                     # candidate
    h = g * r + (1.0 - g) * h_last                              # hidden update

    # ---- output path: x@[Wpx|Wox] issued here so the MXU overlaps the EUP chain,
    #      and only the new-h projection waits on the gate math ----
    xw2 = jnp.dot(xm, wx2_ref[...], preferred_element_type=jnp.float32) + b2_ref[...]
    hw2 = jnp.dot(h.astype(mm_dtype), wh2_ref[...], preferred_element_type=jnp.float32)

    p = jnp.tanh(xw2[:, :Hp] + hw2[:, :Hp])
    o = jax.nn.sigmoid(xw2[:, Hp:] + hw2[:, Hp:])
    # TODO(synk): p/o transcendentals could run in bf16 on v6e/v7x (bf16 EUP); kept f32 so
    # the forward tracks the PyTorch f32 path as closely as possible.

    alpha = alpha_ref[0]
    out_ref[...] = (x.astype(jnp.float32) + alpha * (o * p)).astype(out_ref.dtype)
    hnew_ref[...] = h.astype(hnew_ref.dtype)


# --------------------------------------------------------------------------------------
# one-time parameter packing (call once, reuse for every timestep)
# --------------------------------------------------------------------------------------
def prepare_params(params, *, param_dtype=None):
    """Pad the hidden dim to a lane-dense multiple of 128 and pack the 12 parameters into
    four (Hp, 2Hp) weight blocks and two (1, 2Hp) f32 bias blocks."""
    wgx, wgh, bg, wrx, wrh, br, wpx, wph, bp, wox, woh, bo = params
    H = wgx.shape[0]
    Hp = _round_up(max(H, 128), 128)

    if param_dtype is not None:
        wdt = jnp.dtype(param_dtype)
    else:
        wdt = jnp.dtype(wgx.dtype)
        if wdt == jnp.dtype(jnp.float32):
            # generation / VMEM aware: if resident f32 weights would not fit comfortably
            # in per-core VMEM (e.g. Hp>=1024 on v7x's 64 MiB), feed the MXU in bf16.
            wbuf = 1 if _SINGLE_BUFFER_WEIGHTS else 2
            if wbuf * 8 * Hp * Hp * 4 > 0.6 * _tpu_vmem_capacity_bytes():
                wdt = jnp.dtype(jnp.bfloat16)

    def pad_w(w):
        return jnp.pad(w, ((0, Hp - H), (0, Hp - H))).astype(wdt)

    def pad_b(b):
        return jnp.pad(b.reshape(1, H).astype(jnp.float32), ((0, 0), (0, Hp - H)))

    wx1 = jnp.concatenate([pad_w(wgx), pad_w(wrx)], axis=1)   # (Hp, 2Hp)
    wx2 = jnp.concatenate([pad_w(wpx), pad_w(wox)], axis=1)   # (Hp, 2Hp)
    wh1 = jnp.concatenate([pad_w(wgh), pad_w(wrh)], axis=1)   # (Hp, 2Hp)
    wh2 = jnp.concatenate([pad_w(wph), pad_w(woh)], axis=1)   # (Hp, 2Hp)
    b1 = jnp.concatenate([pad_b(bg), pad_b(br)], axis=1)      # (1, 2Hp) f32
    b2 = jnp.concatenate([pad_b(bp), pad_b(bo)], axis=1)      # (1, 2Hp) f32
    return (wx1, wx2, wh1, wh2, b1, b2)


# --------------------------------------------------------------------------------------
# forward
# --------------------------------------------------------------------------------------
@functools.partial(jax.jit, static_argnames=("batch_tile",))
def eprop_alpha_gate_l0rd(x, h_last, alpha, packed_params, *, batch_tile=None):
    """Returns (out, h_new) with out = x + alpha * l0rd(x); h_new has h_last's dtype."""
    wx1, wx2, wh1, wh2, b1, b2 = packed_params
    B, H = x.shape
    Hp = wx1.shape[0]
    assert Hp % 128 == 0 and H <= Hp and wx1.shape[1] == 2 * Hp
    wdt = wx1.dtype

    # ---- batch tile: MXU-aligned, generation aware, >=2 grid steps when possible ----
    is_bf16 = (jnp.dtype(wdt) == jnp.dtype(jnp.bfloat16)
               or x.dtype == jnp.bfloat16 or h_last.dtype == jnp.bfloat16)
    align = 16 if is_bf16 else 8
    if batch_tile is None:
        cap = 128 if _is_v5e() else 256      # v5e: 128-row MXU; halves worst-case padding
        batch_tile = min(cap, _round_up(B, align))
        if _round_up(B, batch_tile) // batch_tile < 2 and B > align:
            # give the grid >=2 iterations so v7x's two TensorCores both get work
            batch_tile = max(align, min(batch_tile, _round_up((B + 1) // 2, align)))
    batch_tile = _round_up(batch_tile, align)
    Bp = _round_up(B, batch_tile)

    xp = jnp.pad(x, ((0, Bp - B), (0, Hp - H)))
    hp = jnp.pad(h_last, ((0, Bp - B), (0, Hp - H)))
    alpha = jnp.asarray(alpha, jnp.float32).reshape((1,))

    grid = (Bp // batch_tile,)
    row_spec = pl.BlockSpec((batch_tile, Hp), lambda i, a: (i, 0))
    wmode = pl.Buffered(1) if _SINGLE_BUFFER_WEIGHTS else None  # constants: no 2x buffering

    def const_spec(shape):
        return pl.BlockSpec(shape, lambda i, a: (0, 0), pipeline_mode=wmode)

    # ---- explicit, generation-aware VMEM budget ----
    wbuf = 1 if _SINGLE_BUFFER_WEIGHTS else 2
    w_item = jnp.dtype(wdt).itemsize
    o_item = jnp.dtype(x.dtype).itemsize
    hn_item = jnp.dtype(h_last.dtype).itemsize
    weight_bytes = wbuf * (8 * Hp * Hp * w_item + 2 * (2 * Hp) * 4)
    act_bytes = 2 * batch_tile * Hp * (xp.dtype.itemsize + hp.dtype.itemsize + o_item + hn_item)
    inter_bytes = 16 * batch_tile * Hp * 4            # xw1/xw2/hw1/hw2 + g/r/h/p/o (f32)
    vmem_cap = _tpu_vmem_capacity_bytes()
    vmem_limit = int(min(max(1.25 * (weight_bytes + act_bytes + inter_bytes) + (2 << 20),
                             32 << 20),
                         0.85 * vmem_cap))

    cost = pl.CostEstimate(
        flops=2 * Bp * Hp * (8 * Hp),                 # eight HxH matmuls
        transcendentals=4 * Bp * Hp,                  # 3x tanh + 1x sigmoid per element
        bytes_accessed=int(8 * Hp * Hp * w_item + 2 * (2 * Hp) * 4
                           + Bp * Hp * (xp.dtype.itemsize + hp.dtype.itemsize
                                        + o_item + hn_item)),
    )

    out, h_new = pl.pallas_call(
        _l0rd_kernel,
        out_shape=(jax.ShapeDtypeStruct((Bp, Hp), x.dtype),
                   jax.ShapeDtypeStruct((Bp, Hp), h_last.dtype)),
        grid_spec=pltpu.PrefetchScalarGridSpec(
            num_scalar_prefetch=1,                    # alpha -> SMEM
            grid=grid,
            in_specs=[
                row_spec, row_spec,                   # x, h_last
                const_spec((Hp, 2 * Hp)),             # [Wgx|Wrx]
                const_spec((Hp, 2 * Hp)),             # [Wpx|Wox]
                const_spec((Hp, 2 * Hp)),             # [Wgh|Wrh]
                const_spec((Hp, 2 * Hp)),             # [Wph|Woh]
                const_spec((1, 2 * Hp)),              # [bg|br]
                const_spec((1, 2 * Hp)),              # [bp|bo]
            ],
            out_specs=[row_spec, row_spec],
        ),
        # h_last (flat input index 2, counting the scalar-prefetch alpha) aliases h_new
        # (output 1): the recurrent state is updated in place (no extra HBM writeback).
        input_output_aliases={2: 1},
        compiler_params=pltpu.CompilerParams(
            dimension_semantics=("parallel",),
            vmem_limit_bytes=vmem_limit),
        cost_estimate=cost,
    )(alpha, xp, hp, wx1, wx2, wh1, wh2, b1, b2)

    return out[:B, :H], h_new[:B, :H]


# --------------------------------------------------------------------------------------
# pure-JAX reference + init (mirror the PyTorch module; weights stored as (in, out))
# --------------------------------------------------------------------------------------
def reference_forward(x, h_last, alpha, params):
    x = x.astype(jnp.float32)
    h_last = h_last.astype(jnp.float32)
    wgx, wgh, bg, wrx, wrh, br, wpx, wph, bp, wox, woh, bo = [
        p.astype(jnp.float32) for p in params]
    g = jnp.maximum(jnp.tanh(x @ wgx + h_last @ wgh + bg), 0.0)
    r = jnp.tanh(x @ wrx + h_last @ wrh + br)
    h = g * r + (1.0 - g) * h_last
    p = jnp.tanh(x @ wpx + h @ wph + bp)
    o = jax.nn.sigmoid(x @ wox + h @ woh + bo)
    return x + alpha.astype(jnp.float32)[0] * (o * p), h


def init_params(key, num_hidden, *, nonzero_bias=False):
    H = num_hidden
    stdv_ih = (6.0 / (H + H)) ** 0.5
    stdv_hh = (3.0 / H) ** 0.5
    ks = jax.random.split(key, 12)

    def u(k, shape, bound):
        return jax.random.uniform(k, shape, jnp.float32, -bound, bound)

    wgx, wrx, wpx, wox = (u(ks[i], (H, H), stdv_ih) for i in range(4))
    wgh, wrh, wph, woh = (u(ks[i + 4], (H, H), stdv_hh) for i in range(4))
    if nonzero_bias:
        bg, br, bp, bo = (u(ks[i + 8], (1, H), 0.5) for i in range(4))
    else:
        bg = br = bp = bo = jnp.zeros((1, H), jnp.float32)
    return (wgx, wgh, bg, wrx, wrh, br, wpx, wph, bp, wox, woh, bo)


if __name__ == "__main__":
    key = jax.random.PRNGKey(0)
    k_x, k_h, k_p, k_p2 = jax.random.split(key, 4)

    batch_size, num_hidden = 16, 32          # module-scale demo; hidden padded to 128 inside
    reg_lambda = 0.0                         # training-only regularizer (forward-independent)

    x = jax.random.normal(k_x, (batch_size, num_hidden), jnp.float32)
    h0 = jax.random.normal(k_h, (batch_size, num_hidden), jnp.float32) * 0.1

    # (a) module-default init: alpha = 1e-12, zero biases — single step
    params = init_params(k_p, num_hidden)
    packed = prepare_params(params)          # one-time pack/pad, reused below
    alpha = jnp.zeros((1,), jnp.float32) + 1e-12
    out, h_new = eprop_alpha_gate_l0rd(x, h0, alpha, packed)
    jax.block_until_ready((out, h_new))
    ref_out, ref_h = reference_forward(x, h0, alpha, params)
    assert jnp.allclose(out, ref_out, rtol=1e-5, atol=1e-5)
    assert jnp.allclose(h_new, ref_h, rtol=1e-5, atol=1e-5)

    # (b) non-trivial alpha / biases: short recurrent roll-out reusing the packed weights
    params_b = init_params(k_p2, num_hidden, nonzero_bias=True)
    packed_b = prepare_params(params_b)
    alpha_b = jnp.full((1,), 0.7, jnp.float32)
    h_k, h_r = h0, h0.astype(jnp.float32)
    out_k = out_r = None
    for t in range(3):
        xt = x * (0.5 + 0.25 * t)
        out_k, h_k = eprop_alpha_gate_l0rd(xt, h_k, alpha_b, packed_b)
        out_r, h_r = reference_forward(xt, h_r, alpha_b, params_b)
    jax.block_until_ready((out_k, h_k))
    assert jnp.allclose(out_k, out_r, rtol=1e-4, atol=1e-4)
    assert jnp.allclose(h_k, h_r, rtol=1e-4, atol=1e-4)

    # (c) bf16 weights + activations feeding the MXU (f32 accumulation + f32 gate math)
    packed_bf = prepare_params(params_b, param_dtype=jnp.bfloat16)
    xb, hb = x.astype(jnp.bfloat16), h0.astype(jnp.bfloat16)
    out_b, h_new_b = eprop_alpha_gate_l0rd(xb, hb, alpha_b, packed_bf)
    jax.block_until_ready((out_b, h_new_b))
    params_bf = tuple(p.astype(jnp.bfloat16) for p in params_b)
    ref_out_b, ref_h_b = reference_forward(xb, hb, alpha_b, params_bf)
    assert jnp.allclose(out_b.astype(jnp.float32), ref_out_b, rtol=0.05, atol=0.1)
    assert jnp.allclose(h_new_b.astype(jnp.float32), ref_h_b, rtol=0.05, atol=0.1)

    print("KERNEL_OK")
</pallas_src>

<mosaic_0001>
module attributes {stable_mosaic.version = 11 : i64} {
  func.func @_l0rd_kernel(%arg0: i32, %arg1: memref<1xf32, #tpu.memory_space<smem>>, %arg2: memref<8x128xf32, #tpu.memory_space<vmem>>, %arg3: memref<8x128xf32, #tpu.memory_space<vmem>>, %arg4: memref<128x256xf32, #tpu.memory_space<vmem>>, %arg5: memref<128x256xf32, #tpu.memory_space<vmem>>, %arg6: memref<128x256xf32, #tpu.memory_space<vmem>>, %arg7: memref<128x256xf32, #tpu.memory_space<vmem>>, %arg8: memref<1x256xf32, #tpu.memory_space<vmem>>, %arg9: memref<1x256xf32, #tpu.memory_space<vmem>>, %arg10: memref<8x128xf32, #tpu.memory_space<vmem>>, %arg11: memref<8x128xf32, #tpu.memory_space<vmem>>) attributes {dimension_semantics = [#tpu.dimension_semantics<parallel>], iteration_bounds = array<i64: 2>, scalar_prefetch = 1 : i64, scratch_operands = 0 : i64, tpu.core_type = #tpu.core_type<tc>, window_params = [{transform_indices = @transform_0, window_bounds = array<i64: 8, 128>}, {transform_indices = @transform_1, window_bounds = array<i64: 8, 128>}, {pipeline_mode = #tpu.pipeline_mode<synchronous>, transform_indices = @transform_2, window_bounds = array<i64: 128, 256>}, {pipeline_mode = #tpu.pipeline_mode<synchronous>, transform_indices = @transform_3, window_bounds = array<i64: 128, 256>}, {pipeline_mode = #tpu.pipeline_mode<synchronous>, transform_indices = @transform_4, window_bounds = array<i64: 128, 256>}, {pipeline_mode = #tpu.pipeline_mode<synchronous>, transform_indices = @transform_5, window_bounds = array<i64: 128, 256>}, {pipeline_mode = #tpu.pipeline_mode<synchronous>, transform_indices = @transform_6, window_bounds = array<i64: 1, 256>}, {pipeline_mode = #tpu.pipeline_mode<synchronous>, transform_indices = @transform_7, window_bounds = array<i64: 1, 256>}, {transform_indices = @transform_8, window_bounds = array<i64: 8, 128>}, {transform_indices = @transform_9, window_bounds = array<i64: 8, 128>}]} {
    %c0 = arith.constant 0 : index
    %c0_0 = arith.constant 0 : index
    %0 = vector.load %arg2[%c0, %c0_0] : memref<8x128xf32, #tpu.memory_space<vmem>>, vector<8x128xf32>
    %c0_1 = arith.constant 0 : index
    %c0_2 = arith.constant 0 : index
    %1 = vector.load %arg3[%c0_1, %c0_2] : memref<8x128xf32, #tpu.memory_space<vmem>>, vector<8x128xf32>
    %c0_3 = arith.constant 0 : index
    %c0_4 = arith.constant 0 : index
    %2 = vector.load %arg4[%c0_3, %c0_4] : memref<128x256xf32, #tpu.memory_space<vmem>>, vector<128x256xf32>
    %cst = arith.constant dense<0.000000e+00> : vector<8x256xf32>
    %3 = tpu.matmul %0, %2, %cst {dimension_numbers = #tpu.dot_dimension_numbers<[1], [0], [0], [1], [0, 0, 1, 1], [], []>} : vector<8x128xf32>, vector<128x256xf32>, vector<8x256xf32> -> vector<8x256xf32>
    %c0_5 = arith.constant 0 : index
    %c0_6 = arith.constant 0 : index
    %4 = vector.load %arg8[%c0_5, %c0_6] : memref<1x256xf32, #tpu.memory_space<vmem>>, vector<1x256xf32>
    %5 = vector.broadcast %4 : vector<1x256xf32> to vector<8x256xf32>
    %6 = arith.addf %3, %5 : vector<8x256xf32>
    %c0_7 = arith.constant 0 : index
    %c0_8 = arith.constant 0 : index
    %7 = vector.load %arg6[%c0_7, %c0_8] : memref<128x256xf32, #tpu.memory_space<vmem>>, vector<128x256xf32>
    %cst_9 = arith.constant dense<0.000000e+00> : vector<8x256xf32>
    %8 = tpu.matmul %1, %7, %cst_9 {dimension_numbers = #tpu.dot_dimension_numbers<[1], [0], [0], [1], [0, 0, 1, 1], [], []>} : vector<8x128xf32>, vector<128x256xf32>, vector<8x256xf32> -> vector<8x256xf32>
    %9 = vector.extract_strided_slice %6 {offsets = [0, 0], sizes = [8, 128], strides = [1, 1]} : vector<8x256xf32> to vector<8x128xf32>
    %10 = vector.extract_strided_slice %8 {offsets = [0, 0], sizes = [8, 128], strides = [1, 1]} : vector<8x256xf32> to vector<8x128xf32>
    %11 = arith.addf %9, %10 : vector<8x128xf32>
    %12 = math.tanh %11 : vector<8x128xf32>
    %cst_10 = arith.constant 0.000000e+00 : f32
    %13 = vector.broadcast %cst_10 : f32 to vector<8x128xf32>
    %14 = arith.maximumf %12, %13 : vector<8x128xf32>
    %15 = vector.extract_strided_slice %6 {offsets = [0, 128], sizes = [8, 128], strides = [1, 1]} : vector<8x256xf32> to vector<8x128xf32>
    %16 = vector.extract_strided_slice %8 {offsets = [0, 128], sizes = [8, 128], strides = [1, 1]} : vector<8x256xf32> to vector<8x128xf32>
    %17 = arith.addf %15, %16 : vector<8x128xf32>
    %18 = math.tanh %17 : vector<8x128xf32>
    %19 = arith.mulf %14, %18 : vector<8x128xf32>
    %cst_11 = arith.constant 1.000000e+00 : f32
    %20 = vector.broadcast %cst_11 : f32 to vector<8x128xf32>
    %21 = arith.subf %20, %14 : vector<8x128xf32>
    %22 = arith.mulf %21, %1 : vector<8x128xf32>
    %23 = arith.addf %19, %22 : vector<8x128xf32>
    %c0_12 = arith.constant 0 : index
    %c0_13 = arith.constant 0 : index
    %24 = vector.load %arg5[%c0_12, %c0_13] : memref<128x256xf32, #tpu.memory_space<vmem>>, vector<128x256xf32>
    %cst_14 = arith.constant dense<0.000000e+00> : vector<8x256xf32>
    %25 = tpu.matmul %0, %24, %cst_14 {dimension_numbers = #tpu.dot_dimension_numbers<[1], [0], [0], [1], [0, 0, 1, 1], [], []>} : vector<8x128xf32>, vector<128x256xf32>, vector<8x256xf32> -> vector<8x256xf32>
    %c0_15 = arith.constant 0 : index
    %c0_16 = arith.constant 0 : index
    %26 = vector.load %arg9[%c0_15, %c0_16] : memref<1x256xf32, #tpu.memory_space<vmem>>, vector<1x256xf32>
    %27 = vector.broadcast %26 : vector<1x256xf32> to vector<8x256xf32>
    %28 = arith.addf %25, %27 : vector<8x256xf32>
    %c0_17 = arith.constant 0 : index
    %c0_18 = arith.constant 0 : index
    %29 = vector.load %arg7[%c0_17, %c0_18] : memref<128x256xf32, #tpu.memory_space<vmem>>, vector<128x256xf32>
    %cst_19 = arith.constant dense<0.000000e+00> : vector<8x256xf32>
    %30 = tpu.matmul %23, %29, %cst_19 {dimension_numbers = #tpu.dot_dimension_numbers<[1], [0], [0], [1], [0, 0, 1, 1], [], []>} : vector<8x128xf32>, vector<128x256xf32>, vector<8x256xf32> -> vector<8x256xf32>
    %31 = vector.extract_strided_slice %28 {offsets = [0, 0], sizes = [8, 128], strides = [1, 1]} : vector<8x256xf32> to vector<8x128xf32>
    %32 = vector.extract_strided_slice %30 {offsets = [0, 0], sizes = [8, 128], strides = [1, 1]} : vector<8x256xf32> to vector<8x128xf32>
    %33 = arith.addf %31, %32 : vector<8x128xf32>
    %34 = math.tanh %33 : vector<8x128xf32>
    %35 = vector.extract_strided_slice %28 {offsets = [0, 128], sizes = [8, 128], strides = [1, 1]} : vector<8x256xf32> to vector<8x128xf32>
    %36 = vector.extract_strided_slice %30 {offsets = [0, 128], sizes = [8, 128], strides = [1, 1]} : vector<8x256xf32> to vector<8x128xf32>
    %37 = arith.addf %35, %36 : vector<8x128xf32>
    %38 = arith.negf %37 : vector<8x128xf32>
    %39 = math.exp %38 : vector<8x128xf32>
    %cst_20 = arith.constant 1.000000e+00 : f32
    %40 = vector.broadcast %cst_20 : f32 to vector<8x128xf32>
    %41 = arith.addf %40, %39 : vector<8x128xf32>
    %42 = arith.divf %40, %41 : vector<8x128xf32>
    %c0_21 = arith.constant 0 : index
    %43 = memref.load %arg1[%c0_21] : memref<1xf32, #tpu.memory_space<smem>>
    %44 = arith.mulf %42, %34 : vector<8x128xf32>
    %45 = vector.broadcast %43 : f32 to vector<8x128xf32>
    %46 = arith.mulf %45, %44 : vector<8x128xf32>
    %47 = arith.addf %0, %46 : vector<8x128xf32>
    %c0_22 = arith.constant 0 : index
    %c0_23 = arith.constant 0 : index
    %48 = vector.load %arg10[%c0_22, %c0_23] : memref<8x128xf32, #tpu.memory_space<vmem>>, vector<8x128xf32>
    tpu.vector_store %arg10[%c0_22, %c0_23], %47 {strides = array<i32>} : memref<8x128xf32, #tpu.memory_space<vmem>>, vector<8x128xf32>,
    %c0_24 = arith.constant 0 : index
    %c0_25 = arith.constant 0 : index
    %49 = vector.load %arg11[%c0_24, %c0_25] : memref<8x128xf32, #tpu.memory_space<vmem>>, vector<8x128xf32>
    tpu.vector_store %arg11[%c0_24, %c0_25], %23 {strides = array<i32>} : memref<8x128xf32, #tpu.memory_space<vmem>>, vector<8x128xf32>,
    return
  }
  func.func @transform_0(%arg0: i32, %arg1: memref<1xf32, #tpu.memory_space<smem>>) -> (i32, i32) {
    %c0_i32 = arith.constant 0 : i32
    %c0_i32_0 = arith.constant 0 : i32
    return %arg0, %c0_i32 : i32, i32
  }
  func.func @transform_1(%arg0: i32, %arg1: memref<1xf32, #tpu.memory_space<smem>>) -> (i32, i32) {
    %c0_i32 = arith.constant 0 : i32
    %c0_i32_0 = arith.constant 0 : i32
    return %arg0, %c0_i32 : i32, i32
  }
  func.func @transform_2(%arg0: i32, %arg1: memref<1xf32, #tpu.memory_space<smem>>) -> (i32, i32) {
    %c0_i32 = arith.constant 0 : i32
    %c0_i32_0 = arith.constant 0 : i32
    %c0_i32_1 = arith.constant 0 : i32
    return %c0_i32, %c0_i32_0 : i32, i32
  }
  func.func @transform_3(%arg0: i32, %arg1: memref<1xf32, #tpu.memory_space<smem>>) -> (i32, i32) {
    %c0_i32 = arith.constant 0 : i32
    %c0_i32_0 = arith.constant 0 : i32
    %c0_i32_1 = arith.constant 0 : i32
    return %c0_i32, %c0_i32_0 : i32, i32
  }
  func.func @transform_4(%arg0: i32, %arg1: memref<1xf32, #tpu.memory_space<smem>>) -> (i32, i32) {
    %c0_i32 = arith.constant 0 : i32
    %c0_i32_0 = arith.constant 0 : i32
    %c0_i32_1 = arith.constant 0 : i32
    return %c0_i32, %c0_i32_0 : i32, i32
  }
  func.func @transform_5(%arg0: i32, %arg1: memref<1xf32, #tpu.memory_space<smem>>) -> (i32, i32) {
    %c0_i32 = arith.constant 0 : i32
    %c0_i32_0 = arith.constant 0 : i32
    %c0_i32_1 = arith.constant 0 : i32
    return %c0_i32, %c0_i32_0 : i32, i32
  }
  func.func @transform_6(%arg0: i32, %arg1: memref<1xf32, #tpu.memory_space<smem>>) -> (i32, i32) {
    %c0_i32 = arith.constant 0 : i32
    %c0_i32_0 = arith.constant 0 : i32
    %c0_i32_1 = arith.constant 0 : i32
    return %c0_i32, %c0_i32_0 : i32, i32
  }
  func.func @transform_7(%arg0: i32, %arg1: memref<1xf32, #tpu.memory_space<smem>>) -> (i32, i32) {
    %c0_i32 = arith.constant 0 : i32
    %c0_i32_0 = arith.constant 0 : i32
    %c0_i32_1 = arith.constant 0 : i32
    return %c0_i32, %c0_i32_0 : i32, i32
  }
  func.func @transform_8(%arg0: i32, %arg1: memref<1xf32, #tpu.memory_space<smem>>) -> (i32, i32) {
    %c0_i32 = arith.constant 0 : i32
    %c0_i32_0 = arith.constant 0 : i32
    return %arg0, %c0_i32 : i32, i32
  }
  func.func @transform_9(%arg0: i32, %arg1: memref<1xf32, #tpu.memory_space<smem>>) -> (i32, i32) {
    %c0_i32 = arith.constant 0 : i32
    %c0_i32_0 = arith.constant 0 : i32
    return %arg0, %c0_i32 : i32, i32
  }
}

</mosaic_0001>

<bundles_post_ra>
// kernel: eprop_alpha_gate_l0rd.1
= control target key start
LH: loop header
LB: loop body
LE: loop exit
PB: predicated region body
PF: predicated region fallthrough
CT: control target
= control target key end

     0   :  { %s1801_s0 = inlined_call_operand.<no memory space> [shape: f32[1], index: 0, kind: input, shape index: {}]   ;;  %s1802_s1 = inlined_call_operand.vmem [shape: f32[16,128], index: 1, kind: input, shape index: {}]   ;;  %s1803_s2 = inlined_call_operand.vmem [shape: f32[16,128], index: 2, kind: input, shape index: {}, may-alias: {2,10}]   ;;  %s1804_s3 = inlined_call_operand.hbm [shape: f32[128,256], index: 3, kind: input, shape index: {}]   ;;  %s1805_s4 = inlined_call_operand.hbm [shape: f32[128,256], index: 4, kind: input, shape index: {}]   ;;  %s1806_s5 = inlined_call_operand.hbm [shape: f32[128,256], index: 5, kind: input, shape index: {}]   ;;  %s1807_s6 = inlined_call_operand.hbm [shape: f32[128,256], index: 6, kind: input, shape index: {}]   ;;  %s1808_s7 = inlined_call_operand.vmem [shape: f32[1,256], index: 7, kind: input, shape index: {}]   ;;  %s1809_s8 = inlined_call_operand.vmem [shape: f32[1,256], index: 8, kind: input, shape index: {}]   ;;  %s1810_s9 = inlined_call_operand.hbm [shape: f32[16,128], index: 9, kind: output, shape index: {0}]   ;;  %s1811_s10 = inlined_call_operand.vmem [shape: f32[16,128], index: 10, kind: output, shape index: {1}, may-alias: {2,10}]  }
   0x1   :  { %16 = sst [smem:[#allocation3]] %s1801_s0 }
   0x2   :  { %17 = vsyncpa [#allocation5], 0 }
   0x3   :  { %18 = vsyncpa [#allocation8], 0 }
   0x4   :  { %19 = vsyncpa [#allocation11], 0 }
   0x5   :  { %20 = vsyncpa [#allocation6], 0 }
   0x6   :  { %22 = vsyncpa [#allocation6 + $0x1], 0  ;;  %s1541_s15 = smov 0   ;;  %s1543_s16 = smov 0  }
   0x7   :  { %s1545_s17 = smov 0   ;;  %s1547_s18 = smov 0  }
   0x8 LB: > { %1820 = sst [smem:[#allocation17_spill]] %s1461_s15  ;;  %s1562_s0 = sadd.s32 4294967295, %s1473_s18   ;;  %s1473_s18 = sphi %s1547_s18, %s1841_s18   ;;  %s1469_s17 = sphi %s1545_s17, %s1846_s17   ;;  %s1465_s16 = sphi %s1543_s16, %s1845_s16   ;;  %s1461_s15 = sphi %s1541_s15, %s1844_s15  }
   0x9   : > { %1821 = sst [smem:[#allocation18_spill]] %s1469_s17  ;;  %s1037_s19 = sadd.s32 4294967294, %s1473_s18  }
   0xa   : > { %s1566_s20 = sadd.s32 1, %s1473_s18   ;;  %s213_s21 = sadd.s32 1, %s1469_s17 }
   0xb   : > { %1822 = sst [smem:[#allocation19_spill]] %s1566_s20  ;;  %s210_s22 = ssub.s32 %s1473_s18, %s1566_s20 }
   0xc   : > { %p223_p0 = scmp.ne.s32.totalorder %s1469_s17, %s1465_s16  ;;  %p211_p1 = scmp.eq.s32.totalorder %s210_s22, 0 }
   0xd   : > { %p224_p2 = scmp.eq.s32.totalorder %s1562_s0, 1  ;;  %p229_p3 = scmp.ne.s32.totalorder %s1465_s16, %s1461_s15 }
   0xe   : > { %p230_p4 = scmp.eq.s32.totalorder %s1037_s19, 1  ;;  %p1038_p7 = scmp.ge.s32.totalorder %s1473_s18, 1 }
   0xf   : > { %s1577_s23 = scalar_select %p211_p1, %s1469_s17, %s213_s21  }
  0x10   : > { %p1579_p5 = por %p224_p2, %p223_p0  ;;  %p1583_p6 = por %p230_p4, %p229_p3 }
  0x11   : > { %1823 = sst [smem:[#allocation20_spill]] %s1577_s23  ;;  %p263_p8 = scmp.lt.s32.totalorder %s1473_s18, 3 }
  0x12   : > { %s1824_s24 = scalar_select %p1579_p5, 1, 0 }
  0x13   : > { %s1825_s25 = scalar_select %p1583_p6, 1, 0 }
  0x14   : > { %p1812_p9 = scmp.eq.s32.totalorder %s1562_s0, 0  ;;  %p1590_p10 = pnand %p1038_p7, %p263_p8 }
  0x15   : > { %1826 = sst [smem:[#allocation21_spill]] %s1825_s25  ;;  %s1475_s27 = smov [#allocation7]  }
  0x16   : > { %s1827_s26 = scalar_select %p1590_p10, 1, 0 }
  0x17   : > { %p1212_p11 = pneg %p1590_p10  ;;  %s288_s28 = sshll.u32 %s1475_s27, 4  ;;  %s1596_s28 = int_to_ptr.vmem [resolvable:$true] %s288_s28 }
  0x18   : > { %s1476_s30 = smov [#allocation4]   ;;  %s1477_s12 = smov [#allocation9]  }
  0x19   : > { %p1600_p12 = pnand %p1812_p9, %p1212_p11  ;;  %s275_s11 = sshll.u32 %s1476_s30, 4  ;;  %s1604_s11 = int_to_ptr.vmem [resolvable:$true] %s275_s11 }
  0x1a   : > { %s1606_s13 = sshll.u32 %s1477_s12, 4  ;;  %s1287_s21 = scalar_lea.hbm %s1805_s4, 4096  ;;  %s302_s13 = int_to_ptr.vmem [resolvable:$true] %s1606_s13 }
  0x1b   : > { %p1288_p13 = scmp.ne.s32.totalorder %s1805_s4, %s1287_s21  ;;  %p1616_p0 = pneg %p1600_p12 }
  0x1c   : > { %p1294_p3 = scmp.lt.u32.totalorder %s1287_s21, %s1805_s4 }
  0x1d   : > { %p1290_p1 = pnand %p1616_p0, %p1288_p13 }
  0x1f   : > { %p1291_p2 = pneg %p1290_p1 }
  0x21   : > { %p1296_p4 = pnand %p1294_p3, %p1291_p2 }
  0x23   : > { %1299 = shalt.err (!%p1296_p4)
}
  0x24   : > { %s1300_s14 = scalar_lea.vmem %s1596_s28, 4096  ;;  %p1308_p9 = scmp.lt.s32.totalorder %s1596_s28, %s1596_s28 }
  0x25   : > { %p1301_p7 = scmp.ne.s32.totalorder %s1596_s28, %s1300_s14  ;;  %p1309_p6 = scmp.lt.s32.totalorder %s1300_s14, %s1300_s14 }
  0x27   : > { %p1303_p8 = pnand %p1301_p7, %p1616_p0  ;;  %p1310_p13 = por %p1309_p6, %p1308_p9 }
  0x29   : > { %p1304_p11 = pneg %p1303_p8 }
  0x2b   : > { %p1311_p1 = pnand %p1310_p13, %p1304_p11 }
  0x2d   : > { %1314 = shalt.err (!%p1311_p1)
}
  0x2e   : > { %s1478_s19 = smov 256   ;;  %s1479_s21 = smov 16  }
  0x2f   : > { %1218 = dma.hbm_to_vmem [thread:$0]  (!%p1600_p12), %s1805_s4, 4096, %s1596_s28, [#allocation8], %s1478_s19, %s1478_s19, %s1479_s21  }
  0x30   : > { %s1315_s14 = scalar_lea.hbm %s1804_s3, 4096 }
  0x31   : > { %p1316_p6 = scmp.ne.s32.totalorder %s1804_s3, %s1315_s14  ;;  %p1322_p3 = scmp.lt.u32.totalorder %s1315_s14, %s1804_s3 }
  0x33   : > { %p1318_p9 = pnand %p1316_p6, %p1616_p0 }
  0x35   : > { %p1319_p2 = pneg %p1318_p9 }
  0x37   : > { %p1324_p4 = pnand %p1322_p3, %p1319_p2 }
  0x39   : > { %1327 = shalt.err (!%p1324_p4)
}
  0x3a   : > { %s1328_s28 = scalar_lea.vmem %s1604_s11, 4096  ;;  %p1336_p13 = scmp.lt.s32.totalorder %s1604_s11, %s1604_s11 }
  0x3b   : > { %p1329_p7 = scmp.ne.s32.totalorder %s1604_s11, %s1328_s28  ;;  %p1337_p1 = scmp.lt.s32.totalorder %s1328_s28, %s1328_s28 }
  0x3d   : > { %p1331_p8 = pnand %p1329_p7, %p1616_p0  ;;  %p1338_p6 = por %p1337_p1, %p1336_p13 }
  0x3f   : > { %p1332_p11 = pneg %p1331_p8 }
  0x41   : > { %p1339_p9 = pnand %p1338_p6, %p1332_p11 }
  0x43   : > { %1342 = shalt.err (!%p1339_p9)
}
  0x44   : > { %1215 = dma.hbm_to_vmem [thread:$0]  (!%p1600_p12), %s1804_s3, 4096, %s1604_s11, [#allocation5], %s1478_s19, %s1478_s19, %s1479_s21  }
  0x45   : > { %s1343_s22 = scalar_lea.hbm %s1806_s5, 4096 }
  0x46   : > { %p1344_p2 = scmp.ne.s32.totalorder %s1806_s5, %s1343_s22  ;;  %p1350_p7 = scmp.lt.u32.totalorder %s1343_s22, %s1806_s5 }
  0x48   : > { %p1346_p3 = pnand %p1344_p2, %p1616_p0 }
  0x4a   : > { %p1347_p4 = pneg %p1346_p3 }
  0x4c   : > { %p1352_p8 = pnand %p1350_p7, %p1347_p4 }
  0x4e   : > { %1355 = shalt.err (!%p1352_p8)
}
  0x4f   : > { %s1356_s28 = scalar_lea.vmem %s302_s13, 4096  ;;  %p1364_p6 = scmp.lt.s32.totalorder %s302_s13, %s302_s13 }
  0x50   : > { %p1357_p11 = scmp.ne.s32.totalorder %s302_s13, %s1356_s28  ;;  %p1365_p9 = scmp.lt.s32.totalorder %s1356_s28, %s1356_s28 }
  0x52   : > { %p1359_p13 = pnand %p1357_p11, %p1616_p0  ;;  %p1366_p5 = por %p1365_p9, %p1364_p6 }
  0x54   : > { %p1360_p1 = pneg %p1359_p13 }
  0x56   : > { %p1367_p10 = pnand %p1366_p5, %p1360_p1 }
  0x58   : > { %1370 = shalt.err (!%p1367_p10)
}
  0x59   : > { %1221 = dma.hbm_to_vmem [thread:$0]  (!%p1600_p12), %s1806_s5, 4096, %s302_s13, [#allocation8], %s1478_s19, %s1478_s19, %s1479_s21  }
  0x5a   : > { %s1480_s17 = smov [#allocation10]   ;;  %s1371_s27 = scalar_lea.hbm %s1807_s6, 4096 }
  0x5b   : > { %s314_s20 = sshll.u32 %s1480_s17, 4  ;;  %p1372_p5 = scmp.ne.s32.totalorder %s1807_s6, %s1371_s27  ;;  %s315_s20 = int_to_ptr.vmem [resolvable:$true] %s314_s20 }
  0x5c   : > { %p1378_p3 = scmp.lt.u32.totalorder %s1371_s27, %s1807_s6 }
  0x5d   : > { %p1374_p10 = pnand %p1372_p5, %p1616_p0 }
  0x5f   : > { %p1375_p2 = pneg %p1374_p10 }
  0x61   : > { %p1380_p4 = pnand %p1378_p3, %p1375_p2 }
  0x63   : > { %1383 = shalt.err (!%p1380_p4)
}
  0x64   : > { %s1384_s13 = scalar_lea.vmem %s315_s20, 4096  ;;  %p1392_p13 = scmp.lt.s32.totalorder %s315_s20, %s315_s20 }
  0x65   : > { %p1385_p7 = scmp.ne.s32.totalorder %s315_s20, %s1384_s13  ;;  %p1393_p1 = scmp.lt.s32.totalorder %s1384_s13, %s1384_s13 }
  0x67   : > { %p1387_p8 = pnand %p1385_p7, %p1616_p0  ;;  %p1394_p6 = por %p1393_p1, %p1392_p13 }
  0x69   : > { %p1388_p11 = pneg %p1387_p8 }
  0x6b   : > { %p1395_p9 = pnand %p1394_p6, %p1388_p11 }
  0x6d   : > { %1398 = shalt.err (!%p1395_p9)
}
  0x6e   : > { %1224 = dma.hbm_to_vmem [thread:$0]  (!%p1600_p12), %s1807_s6, 4096, %s315_s20, [#allocation11], %s1478_s19, %s1478_s19, %s1479_s21  }
  0x6f   : > { %p1830_p5 = scmp.ne.s32.totalorder %s1827_s26, 0 }
  0x70   : > { %p1831_p0 = scmp.eq.s32.totalorder (!%p1830_p5), %s1562_s0, 0 }
  0x71   : > { %350 = sbr.rel (%p1830_p5) target bundleno = 688 (0x2b0), region = 52 }
  0x78   : > { %1444 = dma.done.wait (%p1831_p0), [#allocation5], 4096   ;;  %p1832_p10 = pmov %p1831_p0 }
  0x79   : > { %p1833_p2 = pmov %p1831_p0 }
  0x7a   : > { %1446 = vsyncadd (%p1832_p10), [#allocation5], 4294963200 }
  0x7b   : > { %1448 = dma.done.wait (%p1833_p2), [#allocation8], 8192   ;;  %p1834_p3 = pmov %p1831_p0 }
  0x7c   : > { %p1835_p4 = pmov %p1831_p0 }
  0x7d   : > { %1450 = vsyncadd (%p1834_p3), [#allocation8], 4294959104 }
  0x7e   : > { %1452 = dma.done.wait (%p1835_p4), [#allocation11], 4096   ;;  %p1836_p12 = pmov %p1831_p0 }
  0x7f   : > { %v1481_v0 = vmov 0.0   ;;  %v420_v1 = vld [vmem:[#allocation4 + $0x8] sm:$0xff]  ;;  %v422_v2 = vld [vmem:[#allocation4 + $0x18] sm:$0xff]  ;;  %v419_v3 = vld [vmem:[#allocation4] sm:$0xff]  ;;  %p405_p7 = scmp.lt.s32.totalorder %s1562_s0, 1  ;;  %s873_s11 = sld [smem:[#allocation3]] }
  0x80   : > { %1454 = vsyncadd (%p1836_p12), [#allocation11], 4294963200  ;;  %527 = vmatprep.mubr.f32.mxu0 %v1481_v0  ;;  %754 = vmatprep.mubr.f32.mxu1 %v1481_v0  ;;  %v1058_v4 = vpack.c.bf16 %v422_v2, %v420_v1  ;;  %v421_v5 = vld [vmem:[#allocation4 + $0x10] sm:$0xff]  ;;  %v424_v6 = vld [vmem:[#allocation4 + $0x28] sm:$0xff]  ;;  %s396_s15 = sand.u32 1, %s1465_s16   ;;  %p1837_p11 = scmp.ne.s32.totalorder %s1824_s24, 0 }
  0x81   : > { %v426_v7 = vld [vmem:[#allocation4 + $0x38] sm:$0xff]  ;;  %v1060_v8 = vpack.c.bf16 %v421_v5, %v419_v3  ;;  %v423_v10 = vld [vmem:[#allocation4 + $0x20] sm:$0xff]  ;;  %v425_v11 = vld [vmem:[#allocation4 + $0x30] sm:$0xff]  ;;  %s406_s23 = scalar_select %p405_p7, %s1562_s0, 1 }
  0x82   : > { %v1062_v9 = vpack.c.bf16 %v426_v7, %v424_v6  ;;  %v428_v12 = vld [vmem:[#allocation4 + $0x48] sm:$0xff]  ;;  %1059 = vmatprep.subr.bf16.mxu0 %v1058_v4  ;;  %v430_v13 = vld [vmem:[#allocation4 + $0x58] sm:$0xff]  ;;  %v1064_v14 = vpack.c.bf16 %v425_v11, %v423_v10  ;;  %v427_v16 = vld [vmem:[#allocation4 + $0x40] sm:$0xff] }
  0x83   : > { %1061 = vmatpush1.bf16.msra.mxu0 %v1060_v8  ;;  %v1066_v15 = vpack.c.bf16 %v430_v13, %v428_v12  ;;  %v429_v17 = vld [vmem:[#allocation4 + $0x50] sm:$0xff]  ;;  %v432_v18 = vld [vmem:[#allocation4 + $0x68] sm:$0xff]  ;;  %v434_v19 = vld [vmem:[#allocation4 + $0x78] sm:$0xff]  ;;  %s1727_s26 = sshll.u32 %s406_s23, 3  ;;  %s1049_s23 = sshll.u32 %s396_s15, 3 }
  0x84   : > { %1063 = vmatprep.subr.bf16.mxu0 %v1062_v9  ;;  %v1068_v20 = vpack.c.bf16 %v429_v17, %v427_v16  ;;  %v1070_v21 = vpack.c.bf16 %v434_v19, %v432_v18  ;;  %v431_v22 = vld [vmem:[#allocation4 + $0x60] sm:$0xff]  ;;  %v433_v23 = vld [vmem:[#allocation4 + $0x70] sm:$0xff]  ;;  %v436_v24 = vld [vmem:[#allocation4 + $0x88] sm:$0xff]  ;;  %s408_s21 = scalar_lea.vmem %s1802_s1, %s1727_s26  ;;  %s412_s25 = scalar_lea.vmem %s1803_s2, %s1727_s26 }
  0x85   : > { %v438_v25 = vld [vmem:[#allocation4 + $0x98] sm:$0xff]  ;;  %v1072_v26 = vpack.c.bf16 %v433_v23, %v431_v22  ;;  %v435_v28 = vld [vmem:[#allocation4 + $0x80] sm:$0xff]  ;;  %v437_v29 = vld [vmem:[#allocation4 + $0x90] sm:$0xff]  ;;  %s416_s14 = scalar_lea.vmem %s1811_s10, %s1727_s26  ;;  %s1055_s26 = sshll.u32 %s1562_s0, 7 }
  0x86   : > { %v1074_v27 = vpack.c.bf16 %v438_v25, %v436_v24  ;;  %v440_v30 = vld [vmem:[#allocation4 + $0xa8] sm:$0xff]  ;;  %v442_v31 = vld [vmem:[#allocation4 + $0xb8] sm:$0xff]  ;;  %v1076_v32 = vpack.c.bf16 %v437_v29, %v435_v28  ;;  %v439_v34 = vld [vmem:[#allocation4 + $0xa0] sm:$0xff]  ;;  %s398_s29 = scalar_lea.vmem [#allocation12], %s1049_s23  ;;  %s1759_s20 = scalar_lea.hbm %s1810_s9, %s1055_s26 }
  0x87   : > { %1065 = vmatpush1.bf16.msra.mxu0 %v1064_v14  ;;  %v1078_v33 = vpack.c.bf16 %v442_v31, %v440_v30  ;;  %v441_v35 = vld [vmem:[#allocation4 + $0xb0] sm:$0xff]  ;;  %v444_v36 = vld [vmem:[#allocation4 + $0xc8] sm:$0xff]  ;;  %v446_v37 = vld [vmem:[#allocation4 + $0xd8] sm:$0xff]  ;;  %s898_s19 = sshll.u32 %s398_s29, 4  ;;  %s1482_s0 = smov [#allocation12]   ;;  %s1761_s19 = int_to_ptr.vmem [resolvable:$true] %s898_s19 }
  0x88   : > { %1067 = vmatprep.subr.bf16.mxu0 %v1066_v15  ;;  %v1080_v38 = vpack.c.bf16 %v441_v35, %v439_v34  ;;  %v443_v39 = vld [vmem:[#allocation4 + $0xc0] sm:$0xff]  ;;  %v1082_v40 = vpack.c.bf16 %v446_v37, %v444_v36  ;;  %v445_v41 = vld [vmem:[#allocation4 + $0xd0] sm:$0xff]  ;;  %v448_v42 = vld [vmem:[#allocation4 + $0xe8] sm:$0xff]  ;;  %s1399_s22 = scalar_lea.vmem %s1761_s19, 128  ;;  %s1403_s27 = sshll.u32 %s1482_s0, 4  ;;  %s1404_s27 = int_to_ptr.vmem [resolvable:$false] %s1403_s27 }
  0x89   : > { %v450_v43 = vld [vmem:[#allocation4 + $0xf8] sm:$0xff]  ;;  %v647_v44 = vld [vmem:[#allocation7 + $0x8] sm:$0xff]  ;;  %v646_v46 = vld [vmem:[#allocation7] sm:$0xff]  ;;  %v1084_v51 = vpack.c.bf16 %v445_v41, %v443_v39  ;;  %p1400_p8 = scmp.ne.s32.totalorder %s1761_s19, %s1399_s22  ;;  %s1405_s30 = scalar_lea.vmem %s1404_s27, 256 }
  0x8a   : > { %v649_v45 = vld [vmem:[#allocation7 + $0x18] sm:$0xff]  ;;  %v648_v48 = vld [vmem:[#allocation7 + $0x10] sm:$0xff]  ;;  %v651_v49 = vld [vmem:[#allocation7 + $0x28] sm:$0xff]  ;;  %v1086_v57 = vpack.c.bf16 %v450_v43, %v448_v42  ;;  %p1406_p6 = scmp.lt.s32.totalorder %s1761_s19, %s1404_s27  ;;  %p1407_p9 = scmp.lt.s32.totalorder %s1405_s30, %s1399_s22 }
  0x8b   : > { %1069 = vmatpush1.bf16.msra.mxu0 %v1068_v20  ;;  %v1122_v47 = vpack.c.bf16 %v649_v45, %v647_v44  ;;  %v653_v50 = vld [vmem:[#allocation7 + $0x38] sm:$0xff]  ;;  %v1124_v52 = vpack.c.bf16 %v648_v48, %v646_v46  ;;  %v650_v54 = vld [vmem:[#allocation7 + $0x20] sm:$0xff]  ;;  %v652_v55 = vld [vmem:[#allocation7 + $0x30] sm:$0xff]  ;;  %p1401_p13 = pnand %p1400_p8, %p1837_p11 }
  0x8c   : > { %1071 = vmatprep.subr.bf16.mxu0 %v1070_v21  ;;  %v1126_v53 = vpack.c.bf16 %v653_v50, %v651_v49  ;;  %v655_v56 = vld [vmem:[#allocation7 + $0x48] sm:$0xff]  ;;  %v447_v58 = vld [vmem:[#allocation4 + $0xe0] sm:$0xff]  ;;  %v449_v59 = vld [vmem:[#allocation4 + $0xf0] sm:$0xff]  ;;  %v1128_v63 = vpack.c.bf16 %v652_v55, %v650_v54  ;;  %p1408_p5 = por %p1407_p9, %p1406_p6 }
  0x8d   : > { %1123 = vmatprep.subr.bf16.mxu1 %v1122_v47  ;;  %v657_v60 = vld [vmem:[#allocation7 + $0x58] sm:$0xff]  ;;  %v535_v61 = vld [vmem:[#allocation9 + $0x8] sm:$0xff]  ;;  %v654_v2 = vld [vmem:[#allocation7 + $0x40] sm:$0xff]  ;;  %v1088_v4 = vpack.c.bf16 %v449_v59, %v447_v58  ;;  %p1402_p1 = pneg %p1401_p13 }
  0x8e   : > { %v537_v62 = vld [vmem:[#allocation9 + $0x18] sm:$0xff]  ;;  %1125 = vmatpush1.bf16.msra.mxu1 %v1124_v52  ;;  %v1130_v1 = vpack.c.bf16 %v657_v60, %v655_v56  ;;  %v656_v3 = vld [vmem:[#allocation7 + $0x50] sm:$0xff]  ;;  %v659_v5 = vld [vmem:[#allocation7 + $0x68] sm:$0xff] }
  0x8f   : > { %1073 = vmatpush1.bf16.msra.mxu0 %v1072_v26  ;;  %1127 = vmatprep.subr.bf16.mxu1 %v1126_v53  ;;  %v661_v6 = vld [vmem:[#allocation7 + $0x78] sm:$0xff]  ;;  %v1090_v7 = vpack.c.bf16 %v537_v62, %v535_v61  ;;  %v534_v8 = vld [vmem:[#allocation9] sm:$0xff]  ;;  %v536_v9 = vld [vmem:[#allocation9 + $0x10] sm:$0xff]  ;;  %v1132_v12 = vpack.c.bf16 %v656_v3, %v654_v2  ;;  %p1409_p0 = pnand %p1408_p5, %p1402_p1 }
  0x90   : > { %1075 = vmatprep.subr.bf16.mxu0 %v1074_v27  ;;  %v539_v10 = vld [vmem:[#allocation9 + $0x28] sm:$0xff]  ;;  %v541_v11 = vld [vmem:[#allocation9 + $0x38] sm:$0xff]  ;;  %v1134_v13 = vpack.c.bf16 %v661_v6, %v659_v5  ;;  %v658_v14 = vld [vmem:[#allocation7 + $0x60] sm:$0xff]  ;;  %v1092_v17 = vpack.c.bf16 %v536_v9, %v534_v8 }
  0x91   : > { %v660_v15 = vld [vmem:[#allocation7 + $0x70] sm:$0xff]  ;;  %v1733_v16 = vld [vmem:[%s408_s21] sm:$0xff]  ;;  %v663_v18 = vld [vmem:[#allocation7 + $0x88] sm:$0xff]  ;;  %v1094_v20 = vpack.c.bf16 %v541_v11, %v539_v10 }
  0x92   : > { %1129 = vmatpush1.bf16.msra.mxu1 %v1128_v63  ;;  %v665_v19 = vld [vmem:[#allocation7 + $0x98] sm:$0xff]  ;;  %v538_v21 = vld [vmem:[#allocation9 + $0x20] sm:$0xff]  ;;  %v540_v22 = vld [vmem:[#allocation9 + $0x30] sm:$0xff]  ;;  %v1136_v25 = vpack.c.bf16 %v660_v15, %v658_v14 }
  0x93   : > { %1077 = vmatpush1.bf16.msra.mxu0 %v1076_v32  ;;  %1131 = vmatprep.subr.bf16.mxu1 %v1130_v1  ;;  %v543_v23 = vld [vmem:[#allocation9 + $0x48] sm:$0xff]  ;;  %v545_v24 = vld [vmem:[#allocation9 + $0x58] sm:$0xff]  ;;  %v1138_v26 = vpack.c.bf16 %v665_v19, %v663_v18  ;;  %v662_v27 = vld [vmem:[#allocation7 + $0x80] sm:$0xff]  ;;  %v1096_v29 = vpack.c.bf16 %v540_v22, %v538_v21 }
  0x94   : > { %1079 = vmatprep.subr.bf16.mxu0 %v1078_v33  ;;  %v664_v28 = vld [vmem:[#allocation7 + $0x90] sm:$0xff]  ;;  %v667_v30 = vld [vmem:[#allocation7 + $0xa8] sm:$0xff]  ;;  %v669_v31 = vld [vmem:[#allocation7 + $0xb8] sm:$0xff]  ;;  %v1098_v32 = vpack.c.bf16 %v545_v24, %v543_v23 }
  0x95   : > { %v542_v33 = vld [vmem:[#allocation9 + $0x40] sm:$0xff]  ;;  %v544_v34 = vld [vmem:[#allocation9 + $0x50] sm:$0xff]  ;;  %v547_v35 = vld [vmem:[#allocation9 + $0x68] sm:$0xff]  ;;  %v1140_v37 = vpack.c.bf16 %v664_v28, %v662_v27 }
  0x96   : > { %1133 = vmatpush1.bf16.msra.mxu1 %v1132_v12  ;;  %v549_v36 = vld [vmem:[#allocation9 + $0x78] sm:$0xff]  ;;  %v666_v39 = vld [vmem:[#allocation7 + $0xa0] sm:$0xff]  ;;  %v1100_v41 = vpack.c.bf16 %v544_v34, %v542_v33  ;;  %v671_v42 = vld [vmem:[#allocation7 + $0xc8] sm:$0xff] }
  0x97   : > { %1081 = vmatpush1.bf16.msra.mxu0 %v1080_v38  ;;  %1135 = vmatprep.subr.bf16.mxu1 %v1134_v13  ;;  %v1142_v38 = vpack.c.bf16 %v669_v31, %v667_v30  ;;  %v673_v43 = vld [vmem:[#allocation7 + $0xd8] sm:$0xff]  ;;  %v1102_v44 = vpack.c.bf16 %v549_v36, %v547_v35  ;;  %v546_v45 = vld [vmem:[#allocation9 + $0x60] sm:$0xff]  ;;  %v548_v46 = vld [vmem:[#allocation9 + $0x70] sm:$0xff] }
  0x98   : > { %1083 = vmatprep.subr.bf16.mxu0 %v1082_v40  ;;  %v668_v40 = vld [vmem:[#allocation7 + $0xb0] sm:$0xff]  ;;  %v551_v47 = vld [vmem:[#allocation9 + $0x88] sm:$0xff]  ;;  %v553_v48 = vld [vmem:[#allocation9 + $0x98] sm:$0xff]  ;;  %v1146_v50 = vpack.c.bf16 %v673_v43, %v671_v42  ;;  %v1104_v53 = vpack.c.bf16 %v548_v46, %v546_v45 }
  0x99   : > { %v1144_v49 = vpack.c.bf16 %v668_v40, %v666_v39  ;;  %v672_v52 = vld [vmem:[#allocation7 + $0xd0] sm:$0xff]  ;;  %v675_v54 = vld [vmem:[#allocation7 + $0xe8] sm:$0xff]  ;;  %v677_v55 = vld [vmem:[#allocation7 + $0xf8] sm:$0xff]  ;;  %v1106_v56 = vpack.c.bf16 %v553_v48, %v551_v47 }
  0x9a   : > { %1137 = vmatpush1.bf16.msra.mxu1 %v1136_v25  ;;  %v552_v58 = vld [vmem:[#allocation9 + $0x90] sm:$0xff]  ;;  %v555_v59 = vld [vmem:[#allocation9 + $0xa8] sm:$0xff]  ;;  %v557_v60 = vld [vmem:[#allocation9 + $0xb8] sm:$0xff]  ;;  %v1150_v62 = vpack.c.bf16 %v677_v55, %v675_v54 }
  0x9b   : > { %1085 = vmatpush1.bf16.msra.mxu0 %v1084_v51  ;;  %1139 = vmatprep.subr.bf16.mxu1 %v1138_v26  ;;  %v670_v51 = vld [vmem:[#allocation7 + $0xc0] sm:$0xff]  ;;  %v676_v1 = vld [vmem:[#allocation7 + $0xf0] sm:$0xff]  ;;  %v762_v3 = vld [vmem:[#allocation10 + $0x8] sm:$0xff]  ;;  %v1110_v5 = vpack.c.bf16 %v557_v60, %v555_v59 }
  0x9c   : > { %1087 = vmatprep.subr.bf16.mxu0 %v1086_v57  ;;  %v550_v57 = vld [vmem:[#allocation9 + $0x80] sm:$0xff]  ;;  %v1148_v61 = vpack.c.bf16 %v672_v52, %v670_v51  ;;  %v559_v8 = vld [vmem:[#allocation9 + $0xc8] sm:$0xff]  ;;  %v561_v9 = vld [vmem:[#allocation9 + $0xd8] sm:$0xff] }
  0x9d   : > { %v674_v63 = vld [vmem:[#allocation7 + $0xe0] sm:$0xff]  ;;  %v1108_v2 = vpack.c.bf16 %v552_v58, %v550_v57  ;;  %v763_v13 = vld [vmem:[#allocation10 + $0x10] sm:$0xff]  ;;  %v766_v15 = vld [vmem:[#allocation10 + $0x28] sm:$0xff]  ;;  %v1114_v18 = vpack.c.bf16 %v561_v9, %v559_v8 }
  0x9e   : > { %1141 = vmatpush1.bf16.msra.mxu1 %v1140_v37  ;;  %v554_v6 = vld [vmem:[#allocation9 + $0xa0] sm:$0xff]  ;;  %v1152_v10 = vpack.c.bf16 %v676_v1, %v674_v63  ;;  %v563_v21 = vld [vmem:[#allocation9 + $0xe8] sm:$0xff]  ;;  %v565_v22 = vld [vmem:[#allocation9 + $0xf8] sm:$0xff] }
  0x9f   : > { %1089 = vmatpush1.bf16.msra.mxu0 %v1088_v4  ;;  %1143 = vmatprep.subr.bf16.mxu1 %v1142_v38  ;;  %v764_v4 = vld [vmem:[#allocation10 + $0x18] sm:$0xff]  ;;  %v761_v12 = vld [vmem:[#allocation10] sm:$0xff]  ;;  %v767_v26 = vld [vmem:[#allocation10 + $0x30] sm:$0xff]  ;;  %v1118_v30 = vpack.c.bf16 %v565_v22, %v563_v21 }
  0xa0   : > { %1091 = vmatprep.subr.bf16.mxu0 %v1090_v7  ;;  %v556_v7 = vld [vmem:[#allocation9 + $0xb0] sm:$0xff]  ;;  %v1154_v11 = vpack.c.bf16 %v764_v4, %v762_v3  ;;  %v558_v19 = vld [vmem:[#allocation9 + $0xc0] sm:$0xff]  ;;  %v1156_v23 = vpack.c.bf16 %v763_v13, %v761_v12  ;;  %v770_v28 = vld [vmem:[#allocation10 + $0x48] sm:$0xff] }
  0xa1   : > { %v1112_v14 = vpack.c.bf16 %v556_v7, %v554_v6  ;;  %v765_v25 = vld [vmem:[#allocation10 + $0x20] sm:$0xff]  ;;  %v771_v36 = vld [vmem:[#allocation10 + $0x50] sm:$0xff]  ;;  %v774_v40 = vld [vmem:[#allocation10 + $0x68] sm:$0xff]  ;;  %v453_v6 = vlaneseq }
  0xa2   : > { %528 = vmatmul.mubr.f32.vlgmr.msra.gmra.mrb[0].mxu0 %v1733_v16  ;;  %1145 = vmatpush1.bf16.msra.mxu1 %v1144_v49  ;;  %v562_v31 = vld [vmem:[#allocation9 + $0xe0] sm:$0xff]  ;;  %v1160_v33 = vpack.c.bf16 %v767_v26, %v765_v25  ;;  %v775_v43 = vld [vmem:[#allocation10 + $0x70] sm:$0xff]  ;;  %v778_v45 = vld [vmem:[#allocation10 + $0x88] sm:$0xff] }
  0xa3   : > { %1093 = vmatpush1.bf16.msra.mxu0 %v1092_v17  ;;  %630 = vmatprep.mubr.f32.mxu0 %v1481_v0  ;;  %v768_v17 = vld [vmem:[#allocation10 + $0x38] sm:$0xff]  ;;  %v769_v35 = vld [vmem:[#allocation10 + $0x40] sm:$0xff]  ;;  %v779_v49 = vld [vmem:[#allocation10 + $0x90] sm:$0xff]  ;;  %v454_v7 = vshrl.u32 %v453_v6, 7 }
  0xa4   : > { %1095 = vmatprep.subr.bf16.mxu0 %v1094_v20  ;;  %1147 = vmatprep.subr.bf16.mxu1 %v1146_v50  ;;  %v560_v20 = vld [vmem:[#allocation9 + $0xd0] sm:$0xff]  ;;  %v1158_v24 = vpack.c.bf16 %v768_v17, %v766_v15  ;;  %v1164_v38 = vpack.c.bf16 %v771_v36, %v769_v35  ;;  %v418_v39 = vld [vmem:[%s412_s25] sm:$0xff]  ;;  %v780_v46 = vld [vmem:[#allocation10 + $0x98] sm:$0xff]  ;;  %s881_s25 = scalar_lea.sflag [#allocation6], %s396_s15 }
  0xa5   : > { %v1116_v27 = vpack.c.bf16 %v560_v20, %v558_v19  ;;  %v773_v42 = vld [vmem:[#allocation10 + $0x60] sm:$0xff]  ;;  %v1170_v47 = vpack.c.bf16 %v780_v46, %v778_v45  ;;  %v782_v51 = vld [vmem:[#allocation10 + $0xa8] sm:$0xff]  ;;  %v784_v52 = vld [vmem:[#allocation10 + $0xb8] sm:$0xff]  ;;  %v455_v8 = vsub.s32 0, %v454_v7 }
  0xa6   : > { %1149 = vmatpush1.bf16.msra.mxu1 %v1148_v61  ;;  %v777_v48 = vld [vmem:[#allocation10 + $0x80] sm:$0xff]  ;;  %v783_v55 = vld [vmem:[#allocation10 + $0xb0] sm:$0xff]  ;;  %v786_v57 = vld [vmem:[#allocation10 + $0xc8] sm:$0xff] }
  0xa7   : > { %1097 = vmatpush1.bf16.msra.mxu0 %v1096_v29  ;;  %1151 = vmatprep.subr.bf16.mxu1 %v1150_v62  ;;  %v772_v29 = vld [vmem:[#allocation10 + $0x58] sm:$0xff]  ;;  %v1172_v50 = vpack.c.bf16 %v779_v49, %v777_v48  ;;  %v781_v54 = vld [vmem:[#allocation10 + $0xa0] sm:$0xff]  ;;  %v787_v61 = vld [vmem:[#allocation10 + $0xd0] sm:$0xff] }
  0xa8   : > { %1099 = vmatprep.subr.bf16.mxu0 %v1098_v32  ;;  %v564_v32 = vld [vmem:[#allocation9 + $0xf0] sm:$0xff]  ;;  %v1162_v34 = vpack.c.bf16 %v772_v29, %v770_v28  ;;  %v788_v58 = vld [vmem:[#allocation10 + $0xd8] sm:$0xff]  ;;  %v785_v60 = vld [vmem:[#allocation10 + $0xc0] sm:$0xff] }
  0xa9   : > { %v1120_v37 = vpack.c.bf16 %v564_v32, %v562_v31  ;;  %v1178_v59 = vpack.c.bf16 %v788_v58, %v786_v57  ;;  %v1180_v62 = vpack.c.bf16 %v787_v61, %v785_v60  ;;  %v790_v63 = vld [vmem:[#allocation10 + $0xe8] sm:$0xff]  ;;  %v792_v1 = vld [vmem:[#allocation10 + $0xf8] sm:$0xff]  ;;  %v789_v3 = vld [vmem:[#allocation10 + $0xe0] sm:$0xff] }
  0xaa   : > { %1153 = vmatpush1.bf16.msra.mxu1 %v1152_v10  ;;  %v791_v4 = vld [vmem:[#allocation10 + $0xf0] sm:$0xff]  ;;  %v451_v9 = vld [vmem:[%s1808_s7] sm:$0x3]  ;;  %v459_v10 = vsub.s32 1, %v454_v7 }
  0xab   : > { %1101 = vmatpush1.bf16.msra.mxu0 %v1100_v41  ;;  %1155 = vmatprep.subr.bf16.mxu1 %v1154_v11  ;;  %v456_v11 = vrot.slane %v451_v9, %v455_v8  ;;  %v678_v25 = vld [vmem:[%s1809_s8] sm:$0x3] }
  0xac   : > { %1103 = vmatprep.subr.bf16.mxu0 %v1102_v44  ;;  %v1168_v44 = vpack.c.bf16 %v775_v43, %v773_v42  ;;  %v460_v12 = vrot.slane %v451_v9, %v459_v10  ;;  %v687_v26 = vrot.slane %v678_v25, %v459_v10  ;;  %v683_v31 = vrot.slane %v678_v25, %v455_v8 }
  0xad   : > { %755 = vmatmul.mubr.f32.vlgmr.msra.gmra.mrb[0].mxu1 %v1733_v16 }
  0xae   : > { %1157 = vmatpush1.bf16.msra.mxu1 %v1156_v23  ;;  %857 = vmatprep.mubr.f32.mxu1 %v1481_v0  ;;  %v776_v0 = vld [vmem:[#allocation10 + $0x78] sm:$0xff] }
  0xaf   : > { %1105 = vmatpush1.bf16.msra.mxu0 %v1104_v53  ;;  %1159 = vmatprep.subr.bf16.mxu1 %v1158_v24  ;;  %v1166_v41 = vpack.c.bf16 %v776_v0, %v774_v40  ;;  %v1174_v53 = vpack.c.bf16 %v784_v52, %v782_v51 }
  0xb0   : > { %1107 = vmatprep.subr.bf16.mxu0 %v1106_v56  ;;  %v1176_v56 = vpack.c.bf16 %v783_v55, %v781_v54 }
  0xb2   : > { %1161 = vmatpush1.bf16.msra.mxu1 %v1160_v33 }
  0xb3   : > { %1109 = vmatpush1.bf16.msra.mxu0 %v1108_v2  ;;  %1163 = vmatprep.subr.bf16.mxu1 %v1162_v34  ;;  %v1182_v2 = vpack.c.bf16 %v792_v1, %v790_v63 }
  0xb4   : > { %1111 = vmatprep.subr.bf16.mxu0 %v1110_v5  ;;  %v1184_v5 = vpack.c.bf16 %v791_v4, %v789_v3 }
  0xb6   : > { %1165 = vmatpush1.bf16.msra.mxu1 %v1164_v38 }
  0xb7   : > { %1113 = vmatpush1.bf16.msra.mxu0 %v1112_v14  ;;  %1167 = vmatprep.subr.bf16.mxu1 %v1166_v41 }
  0xb8   : > { %1115 = vmatprep.subr.bf16.mxu0 %v1114_v18 }
  0xba   : > { %1169 = vmatpush1.bf16.msra.mxu1 %v1168_v44 }
  0xbb   : > { %1117 = vmatpush1.bf16.msra.mxu0 %v1116_v27  ;;  %1171 = vmatprep.subr.bf16.mxu1 %v1170_v47 }
  0xbc   : > { %1119 = vmatprep.subr.bf16.mxu0 %v1118_v30 }
  0xbe   : > { %1173 = vmatpush1.bf16.msra.mxu1 %v1172_v50 }
  0xbf   : > { %1121 = vmatpush1.bf16.msra.mxu0 %v1120_v37  ;;  %1175 = vmatprep.subr.bf16.mxu1 %v1174_v53  ;;  %v875_v37 = vstv %s873_s11 }
  0xc2   : > { %631 = vmatmul.mubr.f32.vlgmr.msra.gmra.mrb[0].mxu0 %v418_v39  ;;  %1177 = vmatpush1.bf16.msra.mxu1 %v1176_v56 }
  0xc3   : > { %1179 = vmatprep.subr.bf16.mxu1 %v1178_v59 }
  0xc6   : > { %1181 = vmatpush1.bf16.msra.mxu1 %v1180_v62 }
  0xc7   : > { %1183 = vmatprep.subr.bf16.mxu1 %v1182_v2 }
  0xca   : > { %1185 = vmatpush1.bf16.msra.mxu1 %v1184_v5 }
 0x195   : > { %v632_v13 = vpop.f32.mrb[0].mxu0 }
 0x196   : > { %v1186_v14 = vadd.f32 %v632_v13, %v456_v11  ;;  %v634_v15 = vpop.f32.mrb[1].mxu0 }
 0x197   : > { %v1187_v17 = vadd.f32 %v634_v15, %v460_v12 }
 0x198   : > { %1277 = vtanh.f32 %v1186_v14 }
 0x199   : > { %1279 = vtanh.f32 %v1187_v17 }
 0x1a2   : > { %v1278_v18 = vpop.eup %1277 }
 0x1a3   : > { %v1280_v19 = vpop.eup %1279  ;;  %v639_v20 = vmax.f32 %v1278_v18, 0.0 }
 0x1a5   : > { %v643_v21 = vsub.f32 1.0, %v639_v20  ;;  %v642_v22 = vmul.f32 %v1280_v19, %v639_v20 }
 0x1a7   : > { %v644_v23 = vmul.f32 %v643_v21, %v418_v39 }
 0x1a9   : > { %v645_v24 = vadd.f32 %v644_v23, %v642_v22 }
 0x1ab   : > { %858 = vmatmul.mubr.f32.vlgmr.msra.gmra.mrb[0].mxu1 %v645_v24  ;;  %879 = vst [vmem:[%s416_s14] sm:$0xff] %v645_v24 }
 0x27e   : > { %v859_v27 = vpop.f32.mrb[0].mxu1 }
 0x27f   : > { %v861_v28 = vpop.f32.mrb[1].mxu1  ;;  %v1188_v32 = vadd.f32 %v859_v27, %v683_v31 }
 0x280   : > { %v1189_v29 = vadd.f32 %v861_v28, %v687_v26 }
 0x282   : > { %v1053_v30 = vmul.f32 -1.442695, %v1189_v29 }
 0x284   : > { %1281 = vpow2.f32 %v1053_v30 }
 0x285   : > { %1283 = vtanh.f32 %v1188_v32 }
 0x28e   : > { %v1282_v33 = vpop.eup %1281 }
 0x28f   : > { %v870_v34 = vadd.f32 1.0, %v1282_v33  ;;  %v1284_v35 = vpop.eup %1283 }
 0x291   : > { %1285 = vrcp.f32 %v870_v34 }
 0x29b   : > { %v1286_v36 = vpop.eup %1285 }
 0x29c   : > { %v874_v38 = vmul.f32 %v1286_v36, %v1284_v35 }
 0x29e   : > { %v876_v39 = vmul.f32 %v875_v37, %v874_v38 }
 0x2a0   : > { %v877_v40 = vadd.f32 %v876_v39, %v1733_v16 }
 0x2a2   : > { %878 = vst [vmem:[%s398_s29] sm:$0xff] %v877_v40 }
 0x2a3   : > { %1412 = shalt.err (!%p1409_p0)
}
 0x2a4   : > { %s1413_s12 = scalar_lea.hbm %s1759_s20, 128  ;;  %s1417_s13 = scalar_lea.hbm %s1810_s9, 256 }
 0x2a5   : > { %p1414_p10 = scmp.ne.s32.totalorder %s1759_s20, %s1413_s12  ;;  %p1418_p4 = scmp.lt.u32.totalorder %s1759_s20, %s1810_s9 }
 0x2a6   : > { %p1419_p12 = scmp.lt.u32.totalorder %s1417_s13, %s1413_s12  ;;  %p1421_p8 = scmp.lt.u32.totalorder %s1413_s12, %s1759_s20 }
 0x2a7   : > { %p1415_p2 = pnand %p1414_p10, %p1837_p11 }
 0x2a8   : > { %p1420_p7 = por %p1419_p12, %p1418_p4 }
 0x2a9   : > { %p1416_p3 = pneg %p1415_p2 }
 0x2aa   : > { %p1422_p13 = por %p1421_p8, %p1420_p7 }
 0x2ac   : > { %p1423_p1 = pnand %p1422_p13, %p1416_p3 }
 0x2ae   : > { %1426 = shalt.err (!%p1423_p1)
}
 0x2af   : > { %1210 = dma.vmem_to_hbm [thread:$0]  (%p1837_p11), %s1761_s19, 128, %s1759_s20, %s881_s25  }
 0x2b0 PF: > { %s1838_s23 = sld [smem:[#allocation17_spill]]  ;;  %s1839_s26 = sld [smem:[#allocation21_spill]] }
 0x2b1   : > { %p1237_p6 = scmp.ge.s32.totalorder %s1473_s18, 2 }
 0x2b6   : > { %s913_s29 = sand.u32 1, %s1838_s23   ;;  %p1840_p9 = scmp.ne.s32.totalorder %s1839_s26, 0 }
 0x2b7   : > { %s914_s21 = scalar_lea.sflag [#allocation6], %s913_s29 }
 0x2b8   : > { %p1226_p5 = pnand %p1237_p6, %p1840_p9 }
 0x2ba   : > { %1456 = dma.done.wait (!%p1226_p5), %s914_s21, 128  }
 0x2bb   : > { %1458 = vsyncadd (!%p1226_p5), %s914_s21, 4294967168  ;;  %s1841_s18 = sld [smem:[#allocation19_spill]]  ;;  %s1842_s17 = sld [smem:[#allocation18_spill]] }
 0x2bc   : > { %s1843_s22 = sld [smem:[#allocation20_spill]]  ;;  %s1844_s15 = smov %s1465_s16 }
 0x2c1   : > { %p25_p0 = scmp.ge.s32.totalorder %s1841_s18, 4   ;;  %s1845_s16 = smov %s1842_s17 }
 0x2c2   : > { %s1846_s17 = smov %s1843_s22 }
 0x2c3   :  { %27 = sbr.rel (!%p25_p0) target bundleno = 8 (0x8), region = 119 }
 0x2ca   :  { %926 = vsyncpa [#allocation5], 1 }
 0x2cb   :  { %928 = vsyncpa [#allocation5 + $0x1], 1 }
 0x2cc   :  { %929 = vsyncpa [#allocation8], 1 }
 0x2cd   :  { %930 = vsyncpa [#allocation11], 1 }
 0x2ce   :  { %931 = vsyncpa [#allocation6], 1 }
 0x2cf   :  { %933 = vsyncpa [#allocation6 + $0x1], 1 }

</bundles_post_ra>
